<compile_context>
chip_gen: v7x
topology: tpu7x:2x2x1
jax: 0.10.0
libtpu: 0.0.40
codegen_flags: <defaults>
</compile_context>

<pallas_src>
import functools
import math

import jax
import jax.numpy as jnp
from jax.experimental import pallas as pl
from jax.experimental.pallas import tpu as pltpu


_LANE = 128       # feature/class axes padded to multiples of the TPU lane width
_SUBLANE = 8      # batch tiles must be a multiple of the sublane count
_NEG_INF = -1e30  # bias for padded classes: exp(-1e30 - m) == 0 exactly in f32
_MAX_TILE = 512   # batch tile cap for large batches


def _round_up(n, m):
    return ((n + m - 1) // m) * m


def _choose_batch_tile(batch):
    """Small batch -> single grid step (per-step overhead dominates tiny matmuls).
    Large batch -> <=512-row tiles: pipelined DMA + v7x two-core sharding."""
    b_pad = _round_up(batch, _SUBLANE)
    if b_pad <= _MAX_TILE:
        return b_pad
    return _MAX_TILE


def _mlp_kernel(num_hidden_layers, compute_dtype, *refs):
    """refs = (x_ref, [w_h, b_h]*num_hidden_layers, w_out, b_out, o_ref).

    Weights are pre-transposed to [in_pad, out_pad] (compute_dtype), biases are
    f32 [1, out_pad]. Matmuls run on the MXU with f32 accumulation; ReLU and the
    log-softmax reduction run in f32 on the VPU/EUP/XLU.
    """
    x_ref = refs[0]
    o_ref = refs[-1]
    p = refs[1:-1]

    h = x_ref[...]  # [tb, in_pad] in compute_dtype (bf16 by default)

    # Hidden layers: Linear -> ReLU.  Dropout(p=0.0) is the identity.
    # TODO(synk): dropout with p > 0 (training mode) would need pltpu.prng_* masking.
    for l in range(num_hidden_layers):
        w = p[2 * l][...]
        b = p[2 * l + 1][...]
        a = jnp.dot(h, w, preferred_element_type=jnp.float32) + b
        h = jnp.maximum(a, 0.0).astype(compute_dtype)

    # Output layer.  Padded classes carry a -1e30 bias and zero weights, so they
    # vanish from the softmax denominator; real classes are untouched.
    wo = p[-2][...]
    bo = p[-1][...]
    logits = jnp.dot(h, wo, preferred_element_type=jnp.float32) + bo

    # Numerically-stable log_softmax over the class axis (f32).
    m = jnp.max(logits, axis=-1, keepdims=True)
    z = logits - m
    lse = jnp.log(jnp.sum(jnp.exp(z), axis=-1, keepdims=True))
    o_ref[...] = (z - lse).astype(o_ref.dtype)


def make_net_params(key, inputs, hidden_nodes, hidden_layers, outputs,
                    dtype=jnp.float32):
    """Deterministic synthetic parameters with the same shapes as Net.__init__.

    Weights are stored torch-style as [out_features, in_features]."""
    params = []
    in_dim = inputs
    for h in range(hidden_layers):
        key, kw, kb = jax.random.split(key, 3)
        fan_in = inputs if h == 0 else hidden_nodes
        bound = 1.0 / jnp.sqrt(fan_in)
        w = jax.random.uniform(kw, (hidden_nodes, fan_in), dtype, -bound, bound)
        b = jax.random.uniform(kb, (1, hidden_nodes), dtype, -bound, bound)
        params.append((w, b))
        in_dim = hidden_nodes
    key, kw, kb = jax.random.split(key, 3)
    bound = 1.0 / jnp.sqrt(in_dim)
    w_out = jax.random.uniform(kw, (outputs, in_dim), dtype, -bound, bound)
    b_out = jax.random.uniform(kb, (1, outputs), dtype, -bound, bound)
    params.append((w_out, b_out))
    return params


def prepare_params(params, compute_dtype=jnp.bfloat16):
    """Pre-transpose to [in, out], zero-pad to 128-lane multiples, cast weights
    to compute_dtype.  Biases stay f32; padded output-class biases get -1e30."""
    flat = []
    n_layers = len(params)
    for li, (w, b) in enumerate(params):
        out_f, in_f = w.shape
        in_p = _round_up(in_f, _LANE)
        out_p = _round_up(out_f, _LANE)
        wt = jnp.zeros((in_p, out_p), compute_dtype)
        wt = wt.at[:in_f, :out_f].set(w.T.astype(compute_dtype))
        if li == n_layers - 1:
            bp = jnp.full((1, out_p), _NEG_INF, jnp.float32)
        else:
            bp = jnp.zeros((1, out_p), jnp.float32)
        bp = bp.at[0, :out_f].set(b[0].astype(jnp.float32))
        flat.extend([wt, bp])
    return flat


def net_forward(x, params, hidden_layers, *, batch_tile=None,
                compute_dtype=jnp.bfloat16, out_dtype=None):
    """Run the fused MLP Pallas kernel.  x: [B, inputs]; returns [B, outputs]."""
    B, in_f = x.shape
    outputs = params[-1][0].shape[0]
    out_dtype = x.dtype if out_dtype is None else out_dtype

    in_p = _round_up(in_f, _LANE)
    out_p = _round_up(outputs, _LANE)

    # Batch tiling.
    tb = batch_tile if batch_tile is not None else _choose_batch_tile(B)
    assert tb % _SUBLANE == 0, "batch_tile must be a multiple of 8"
    B_pad = _round_up(B, tb)

    # Pad + cast the input once in the wrapper (halves HBM traffic for x).
    xp = jnp.zeros((B_pad, in_p), compute_dtype)
    xp = xp.at[:B, :in_f].set(x.astype(compute_dtype))

    flat_params = prepare_params(params, compute_dtype)

    # BlockSpecs: tile the batch axis; weights/biases use a constant index_map,
    # so the pipeline fetches them once and keeps them resident in VMEM.
    x_spec = pl.BlockSpec((tb, in_p), lambda i: (i, 0))
    param_specs = [pl.BlockSpec(p.shape, lambda i: (0, 0)) for p in flat_params]
    out_spec = pl.BlockSpec((tb, out_p), lambda i: (i, 0))

    # VMEM budget: double-buffered x/out tiles + 2x each parameter + in-kernel
    # activations, with generous slack; capped at 64 MiB (v7x physical ceiling).
    itemsize_cd = jnp.dtype(compute_dtype).itemsize
    itemsize_out = jnp.dtype(out_dtype).itemsize
    max_hidden_p = max(_round_up(w.shape[0], _LANE) for (w, _) in params)
    act_bytes = 2 * tb * (in_p * itemsize_cd + out_p * itemsize_out)
    par_bytes = 2 * sum(math.prod(p.shape) * p.dtype.itemsize for p in flat_params)
    inter_bytes = 2 * tb * max_hidden_p * (4 + itemsize_cd)
    vmem_limit = int(min(max(4 * (act_bytes + par_bytes + inter_bytes), 16 << 20),
                         64 << 20))

    kernel = functools.partial(_mlp_kernel, hidden_layers, compute_dtype)

    out = pl.pallas_call(
        kernel,
        out_shape=jax.ShapeDtypeStruct((B_pad, out_p), out_dtype),
        grid_spec=pltpu.PrefetchScalarGridSpec(
            num_scalar_prefetch=0,
            grid=(B_pad // tb,),
            in_specs=[x_spec] + param_specs,
            out_specs=out_spec,
        ),
        compiler_params=pltpu.CompilerParams(
            dimension_semantics=("parallel",),
            vmem_limit_bytes=vmem_limit),
    )(xp, *flat_params)

    # Strip batch / class padding.
    return out[:B, :outputs]


def net_reference_f32(x, params, hidden_layers):
    """Plain-JAX f32 reference mirroring the torch forward exactly."""
    h = x.astype(jnp.float32)
    for l in range(hidden_layers):
        w, b = params[l]
        h = jnp.maximum(h @ w.T + b, 0.0)
    w, b = params[-1]
    logits = h @ w.T + b
    return jax.nn.log_softmax(logits, axis=1)


def net_reference_matched(x, params, hidden_layers, compute_dtype):
    """Reference mirroring the kernel's bf16-matmul / f32-accumulate path."""
    h = x.astype(compute_dtype)
    for l in range(hidden_layers):
        w, b = params[l]
        a = jnp.dot(h, w.T.astype(compute_dtype),
                    preferred_element_type=jnp.float32) + b.astype(jnp.float32)
        h = jnp.maximum(a, 0.0).astype(compute_dtype)
    w, b = params[-1]
    logits = jnp.dot(h, w.T.astype(compute_dtype),
                     preferred_element_type=jnp.float32) + b.astype(jnp.float32)
    return jax.nn.log_softmax(logits, axis=1)


if __name__ == "__main__":
    # Small shapes consistent with the module: Net(inputs=32, hidden_nodes=32,
    # hidden_layers=2, outputs=16); batch=16 -> single lane-dense grid step.
    inputs, hidden_nodes, hidden_layers, outputs = 32, 32, 2, 16
    batch = 16

    key = jax.random.PRNGKey(0)
    key, kx = jax.random.split(key)
    x = jax.random.normal(kx, (batch, inputs), jnp.float32)

    params = make_net_params(key, inputs, hidden_nodes, hidden_layers, outputs)

    out = net_forward(x, params, hidden_layers)
    out = jax.block_until_ready(out)
    assert out.shape == (batch, outputs)

    # Tight check vs a reference using the identical bf16/f32 compute path.
    ref_matched = net_reference_matched(x, params, hidden_layers, jnp.bfloat16)
    assert jnp.allclose(out, ref_matched, atol=1e-4, rtol=1e-4), \
        "mismatch vs matched (bf16-compute) reference"

    # Looser check vs full-f32 torch semantics (bf16 weight quantization noise).
    ref_f32 = net_reference_f32(x, params, hidden_layers)
    assert jnp.allclose(out, ref_f32, atol=5e-2, rtol=5e-2), \
        "mismatch vs f32 reference"

    # log_softmax rows must sum to ~1 in prob space.
    assert jnp.allclose(jnp.sum(jnp.exp(out), axis=1), 1.0, atol=1e-5)

    # Also exercise the hidden_layers == 0 branch of the original module
    # (single Linear -> log_softmax) with the same fused kernel.
    params0 = make_net_params(key, inputs, hidden_nodes, 0, outputs)
    out0 = jax.block_until_ready(net_forward(x, params0, 0))
    ref0 = net_reference_matched(x, params0, 0, jnp.bfloat16)
    assert out0.shape == (batch, outputs)
    assert jnp.allclose(out0, ref0, atol=1e-4, rtol=1e-4), \
        "mismatch vs matched reference (hidden_layers=0)"

    print("KERNEL_OK")
</pallas_src>

<mosaic_0001>
module attributes {stable_mosaic.version = 11 : i64} {
  func.func @_mlp_kernel(%arg0: i32, %arg1: memref<16x128xbf16, #tpu.memory_space<vmem>>, %arg2: memref<128x128xbf16, #tpu.memory_space<vmem>>, %arg3: memref<1x128xf32, #tpu.memory_space<vmem>>, %arg4: memref<128x128xbf16, #tpu.memory_space<vmem>>, %arg5: memref<1x128xf32, #tpu.memory_space<vmem>>, %arg6: memref<128x128xbf16, #tpu.memory_space<vmem>>, %arg7: memref<1x128xf32, #tpu.memory_space<vmem>>, %arg8: memref<16x128xf32, #tpu.memory_space<vmem>>) attributes {dimension_semantics = [#tpu.dimension_semantics<parallel>], iteration_bounds = array<i64: 1>, scalar_prefetch = 0 : i64, scratch_operands = 0 : i64, tpu.core_type = #tpu.core_type<tc>, window_params = [{transform_indices = @transform_0, window_bounds = array<i64: 16, 128>}, {pipeline_mode = #tpu.pipeline_mode<synchronous>, transform_indices = @transform_1, window_bounds = array<i64: 128, 128>}, {pipeline_mode = #tpu.pipeline_mode<synchronous>, transform_indices = @transform_2, window_bounds = array<i64: 1, 128>}, {pipeline_mode = #tpu.pipeline_mode<synchronous>, transform_indices = @transform_3, window_bounds = array<i64: 128, 128>}, {pipeline_mode = #tpu.pipeline_mode<synchronous>, transform_indices = @transform_4, window_bounds = array<i64: 1, 128>}, {pipeline_mode = #tpu.pipeline_mode<synchronous>, transform_indices = @transform_5, window_bounds = array<i64: 128, 128>}, {pipeline_mode = #tpu.pipeline_mode<synchronous>, transform_indices = @transform_6, window_bounds = array<i64: 1, 128>}, {transform_indices = @transform_7, window_bounds = array<i64: 16, 128>}]} {
    %c0 = arith.constant 0 : index
    %c0_0 = arith.constant 0 : index
    %0 = vector.load %arg1[%c0, %c0_0] : memref<16x128xbf16, #tpu.memory_space<vmem>>, vector<16x128xbf16>
    %c0_1 = arith.constant 0 : index
    %c0_2 = arith.constant 0 : index
    %1 = vector.load %arg2[%c0_1, %c0_2] : memref<128x128xbf16, #tpu.memory_space<vmem>>, vector<128x128xbf16>
    %c0_3 = arith.constant 0 : index
    %c0_4 = arith.constant 0 : index
    %2 = vector.load %arg3[%c0_3, %c0_4] : memref<1x128xf32, #tpu.memory_space<vmem>>, vector<1x128xf32>
    %cst = arith.constant dense<0.000000e+00> : vector<16x128xf32>
    %3 = tpu.matmul %0, %1, %cst {dimension_numbers = #tpu.dot_dimension_numbers<[1], [0], [0], [1], [0, 0, 1, 1], [], []>} : vector<16x128xbf16>, vector<128x128xbf16>, vector<16x128xf32> -> vector<16x128xf32>
    %4 = vector.broadcast %2 : vector<1x128xf32> to vector<16x128xf32>
    %5 = arith.addf %3, %4 : vector<16x128xf32>
    %cst_5 = arith.constant 0.000000e+00 : f32
    %6 = vector.broadcast %cst_5 : f32 to vector<16x128xf32>
    %7 = arith.maximumf %5, %6 : vector<16x128xf32>
    %8 = arith.truncf %7 : vector<16x128xf32> to vector<16x128xbf16>
    %c0_6 = arith.constant 0 : index
    %c0_7 = arith.constant 0 : index
    %9 = vector.load %arg4[%c0_6, %c0_7] : memref<128x128xbf16, #tpu.memory_space<vmem>>, vector<128x128xbf16>
    %c0_8 = arith.constant 0 : index
    %c0_9 = arith.constant 0 : index
    %10 = vector.load %arg5[%c0_8, %c0_9] : memref<1x128xf32, #tpu.memory_space<vmem>>, vector<1x128xf32>
    %cst_10 = arith.constant dense<0.000000e+00> : vector<16x128xf32>
    %11 = tpu.matmul %8, %9, %cst_10 {dimension_numbers = #tpu.dot_dimension_numbers<[1], [0], [0], [1], [0, 0, 1, 1], [], []>} : vector<16x128xbf16>, vector<128x128xbf16>, vector<16x128xf32> -> vector<16x128xf32>
    %12 = vector.broadcast %10 : vector<1x128xf32> to vector<16x128xf32>
    %13 = arith.addf %11, %12 : vector<16x128xf32>
    %cst_11 = arith.constant 0.000000e+00 : f32
    %14 = vector.broadcast %cst_11 : f32 to vector<16x128xf32>
    %15 = arith.maximumf %13, %14 : vector<16x128xf32>
    %16 = arith.truncf %15 : vector<16x128xf32> to vector<16x128xbf16>
    %c0_12 = arith.constant 0 : index
    %c0_13 = arith.constant 0 : index
    %17 = vector.load %arg6[%c0_12, %c0_13] : memref<128x128xbf16, #tpu.memory_space<vmem>>, vector<128x128xbf16>
    %c0_14 = arith.constant 0 : index
    %c0_15 = arith.constant 0 : index
    %18 = vector.load %arg7[%c0_14, %c0_15] : memref<1x128xf32, #tpu.memory_space<vmem>>, vector<1x128xf32>
    %cst_16 = arith.constant dense<0.000000e+00> : vector<16x128xf32>
    %19 = tpu.matmul %16, %17, %cst_16 {dimension_numbers = #tpu.dot_dimension_numbers<[1], [0], [0], [1], [0, 0, 1, 1], [], []>} : vector<16x128xbf16>, vector<128x128xbf16>, vector<16x128xf32> -> vector<16x128xf32>
    %20 = vector.broadcast %18 : vector<1x128xf32> to vector<16x128xf32>
    %21 = arith.addf %19, %20 : vector<16x128xf32>
    %cst_17 = arith.constant dense<0xFF800000> : vector<16xf32>
    %22 = vector.multi_reduction <maximumf>, %21, %cst_17 [1] : vector<16x128xf32> to vector<16xf32>
    %23 = vector.shape_cast %22 : vector<16xf32> to vector<16x1xf32>
    %24 = vector.broadcast %23 : vector<16x1xf32> to vector<16x128xf32>
    %25 = arith.subf %21, %24 : vector<16x128xf32>
    %26 = math.exp %25 : vector<16x128xf32>
    %cst_18 = arith.constant dense<0.000000e+00> : vector<16xf32>
    %27 = vector.multi_reduction <add>, %26, %cst_18 [1] : vector<16x128xf32> to vector<16xf32>
    %28 = vector.shape_cast %27 : vector<16xf32> to vector<16x1xf32>
    %29 = math.log %28 : vector<16x1xf32>
    %30 = vector.broadcast %29 : vector<16x1xf32> to vector<16x128xf32>
    %31 = arith.subf %25, %30 : vector<16x128xf32>
    %c0_19 = arith.constant 0 : index
    %c0_20 = arith.constant 0 : index
    %32 = vector.load %arg8[%c0_19, %c0_20] : memref<16x128xf32, #tpu.memory_space<vmem>>, vector<16x128xf32>
    tpu.vector_store %arg8[%c0_19, %c0_20], %31 {strides = array<i32>} : memref<16x128xf32, #tpu.memory_space<vmem>>, vector<16x128xf32>,
    return
  }
  func.func @transform_0(%arg0: i32) -> (i32, i32) {
    %c0_i32 = arith.constant 0 : i32
    %c0_i32_0 = arith.constant 0 : i32
    return %arg0, %c0_i32 : i32, i32
  }
  func.func @transform_1(%arg0: i32) -> (i32, i32) {
    %c0_i32 = arith.constant 0 : i32
    %c0_i32_0 = arith.constant 0 : i32
    %c0_i32_1 = arith.constant 0 : i32
    return %c0_i32, %c0_i32_0 : i32, i32
  }
  func.func @transform_2(%arg0: i32) -> (i32, i32) {
    %c0_i32 = arith.constant 0 : i32
    %c0_i32_0 = arith.constant 0 : i32
    %c0_i32_1 = arith.constant 0 : i32
    return %c0_i32, %c0_i32_0 : i32, i32
  }
  func.func @transform_3(%arg0: i32) -> (i32, i32) {
    %c0_i32 = arith.constant 0 : i32
    %c0_i32_0 = arith.constant 0 : i32
    %c0_i32_1 = arith.constant 0 : i32
    return %c0_i32, %c0_i32_0 : i32, i32
  }
  func.func @transform_4(%arg0: i32) -> (i32, i32) {
    %c0_i32 = arith.constant 0 : i32
    %c0_i32_0 = arith.constant 0 : i32
    %c0_i32_1 = arith.constant 0 : i32
    return %c0_i32, %c0_i32_0 : i32, i32
  }
  func.func @transform_5(%arg0: i32) -> (i32, i32) {
    %c0_i32 = arith.constant 0 : i32
    %c0_i32_0 = arith.constant 0 : i32
    %c0_i32_1 = arith.constant 0 : i32
    return %c0_i32, %c0_i32_0 : i32, i32
  }
  func.func @transform_6(%arg0: i32) -> (i32, i32) {
    %c0_i32 = arith.constant 0 : i32
    %c0_i32_0 = arith.constant 0 : i32
    %c0_i32_1 = arith.constant 0 : i32
    return %c0_i32, %c0_i32_0 : i32, i32
  }
  func.func @transform_7(%arg0: i32) -> (i32, i32) {
    %c0_i32 = arith.constant 0 : i32
    %c0_i32_0 = arith.constant 0 : i32
    return %arg0, %c0_i32 : i32, i32
  }
}

</mosaic_0001>

<bundles_post_ra>
// kernel: tpu_custom_call.1
= control target key start
LH: loop header
LB: loop body
LE: loop exit
PB: predicated region body
PF: predicated region fallthrough
CT: control target
= control target key end

     0   :  { %12 = vsyncpa [#allocation3], 0  ;;  %s927_s0 = inlined_call_operand.hbm [shape: bf16[16,128], index: 0, kind: input, shape index: {}]   ;;  %s928_s1 = inlined_call_operand.hbm [shape: bf16[128,128], index: 1, kind: input, shape index: {}]   ;;  %s929_s2 = inlined_call_operand.vmem [shape: f32[1,128], index: 2, kind: input, shape index: {}]   ;;  %s930_s3 = inlined_call_operand.hbm [shape: bf16[128,128], index: 3, kind: input, shape index: {}]   ;;  %s931_s4 = inlined_call_operand.vmem [shape: f32[1,128], index: 4, kind: input, shape index: {}]   ;;  %s932_s5 = inlined_call_operand.hbm [shape: bf16[128,128], index: 5, kind: input, shape index: {}]   ;;  %s933_s6 = inlined_call_operand.vmem [shape: f32[1,128], index: 6, kind: input, shape index: {}]   ;;  %s934_s7 = inlined_call_operand.hbm [shape: f32[16,128], index: 7, kind: output, shape index: {}]  }
   0x1   :  { %13 = vsyncpa [#allocation6], 0 }
   0x2   :  { %14 = vsyncpa [#allocation9], 0 }
   0x3   :  { %15 = vsyncpa [#allocation4], 0  ;;  %s751_s24 = smov [#allocation5]   ;;  %s752_s26 = smov [#allocation2]  }
   0x4   :  { %s33_s25 = sshll.u32 %s751_s24, 4  ;;  %s21_s27 = sshll.u32 %s752_s26, 4  ;;  %s34_s25 = int_to_ptr.vmem [resolvable:$true] %s33_s25  ;;  %s802_s27 = int_to_ptr.vmem [resolvable:$true] %s21_s27 }
   0x5   :  { %s633_s30 = scalar_lea.hbm %s928_s1, 1024 }
   0x6   :  { %p634_p0 = scmp.ne.s32.totalorder %s928_s1, %s633_s30  ;;  %p637_p1 = scmp.lt.u32.totalorder %s633_s30, %s928_s1 }
   0x8   :  { %p639_p2 = pnand %p637_p1, %p634_p0 }
   0xa   :  { %642 = shalt.err (!%p639_p2)
}
   0xb   :  { %s643_s12 = scalar_lea.vmem %s34_s25, 1024  ;;  %p648_p4 = scmp.lt.s32.totalorder %s34_s25, %s34_s25 }
   0xc   :  { %p644_p3 = scmp.ne.s32.totalorder %s34_s25, %s643_s12  ;;  %p649_p5 = scmp.lt.s32.totalorder %s643_s12, %s643_s12 }
   0xe   :  { %p650_p6 = por %p649_p5, %p648_p4 }
  0x10   :  { %p651_p7 = pnand %p650_p6, %p644_p3 }
  0x12   :  { %654 = shalt.err (!%p651_p7)
}
  0x13   :  { %s753_s13 = smov 64   ;;  %s754_s14 = smov 4  }
  0x14   :  { %39 = dma.hbm_to_vmem [thread:$0]  %s928_s1, 1024, %s34_s25, [#allocation6], %s753_s13, %s753_s13, %s754_s14  }
  0x15   :  { %s655_s19 = scalar_lea.hbm %s927_s0, 128 }
  0x16   :  { %p656_p8 = scmp.ne.s32.totalorder %s927_s0, %s655_s19  ;;  %p659_p9 = scmp.lt.u32.totalorder %s655_s19, %s927_s0 }
  0x18   :  { %p661_p10 = pnand %p659_p9, %p656_p8 }
  0x1a   :  { %664 = shalt.err (!%p661_p10)
}
  0x1b   :  { %s665_s24 = scalar_lea.vmem %s802_s27, 128  ;;  %p670_p12 = scmp.lt.s32.totalorder %s802_s27, %s802_s27 }
  0x1c   :  { %p666_p11 = scmp.ne.s32.totalorder %s802_s27, %s665_s24  ;;  %p671_p13 = scmp.lt.s32.totalorder %s665_s24, %s665_s24 }
  0x1e   :  { %p672_p0 = por %p671_p13, %p670_p12 }
  0x20   :  { %p673_p1 = pnand %p672_p0, %p666_p11 }
  0x22   :  { %676 = shalt.err (!%p673_p1)
}
  0x23   :  { %27 = dma.hbm_to_vmem [thread:$0]  %s927_s0, 128, %s802_s27, [#allocation3], %s753_s13, %s753_s13, %s754_s14  }
  0x24   :  { %s755_s26 = smov [#allocation7]   ;;  %s756_s29 = smov [#allocation8]  }
  0x25   :  { %s47_s28 = sshll.u32 %s755_s26, 4  ;;  %s61_s30 = sshll.u32 %s756_s29, 4  ;;  %s48_s28 = int_to_ptr.vmem [resolvable:$true] %s47_s28  ;;  %s839_s30 = int_to_ptr.vmem [resolvable:$true] %s61_s30 }
  0x26   :  { %s677_s10 = scalar_lea.hbm %s930_s3, 1024 }
  0x27   :  { %p678_p2 = scmp.ne.s32.totalorder %s930_s3, %s677_s10  ;;  %p681_p3 = scmp.lt.u32.totalorder %s677_s10, %s930_s3 }
  0x29   :  { %p683_p4 = pnand %p681_p3, %p678_p2 }
  0x2b   :  { %686 = shalt.err (!%p683_p4)
}
  0x2c   :  { %s687_s0 = scalar_lea.vmem %s48_s28, 1024  ;;  %p692_p6 = scmp.lt.s32.totalorder %s48_s28, %s48_s28 }
  0x2d   :  { %p688_p5 = scmp.ne.s32.totalorder %s48_s28, %s687_s0  ;;  %p693_p7 = scmp.lt.s32.totalorder %s687_s0, %s687_s0 }
  0x2f   :  { %p694_p8 = por %p693_p7, %p692_p6 }
  0x31   :  { %p695_p9 = pnand %p694_p8, %p688_p5 }
  0x33   :  { %698 = shalt.err (!%p695_p9)
}
  0x34   :  { %53 = dma.hbm_to_vmem [thread:$0]  %s930_s3, 1024, %s48_s28, [#allocation6], %s753_s13, %s753_s13, %s754_s14  }
  0x35   :  { %s699_s20 = scalar_lea.hbm %s932_s5, 1024 }
  0x36   :  { %p700_p10 = scmp.ne.s32.totalorder %s932_s5, %s699_s20  ;;  %p703_p11 = scmp.lt.u32.totalorder %s699_s20, %s932_s5 }
  0x38   :  { %p705_p12 = pnand %p703_p11, %p700_p10 }
  0x3a   :  { %708 = shalt.err (!%p705_p12)
}
  0x3b   :  { %s709_s1 = scalar_lea.vmem %s839_s30, 1024  ;;  %p714_p0 = scmp.lt.s32.totalorder %s839_s30, %s839_s30 }
  0x3c   :  { %p710_p13 = scmp.ne.s32.totalorder %s839_s30, %s709_s1  ;;  %p715_p1 = scmp.lt.s32.totalorder %s709_s1, %s709_s1 }
  0x3e   :  { %p716_p2 = por %p715_p1, %p714_p0 }
  0x40   :  { %p717_p3 = pnand %p716_p2, %p710_p13 }
  0x42   :  { %720 = shalt.err (!%p717_p3)
}
  0x43   :  { %67 = dma.hbm_to_vmem [thread:$0]  %s932_s5, 1024, %s839_s30, [#allocation9], %s753_s13, %s753_s13, %s754_s14  }
  0x44   :  { %743 = dma.done.wait [#allocation3], 128  }
  0x45   :  { %744 = vsyncadd [#allocation3], 4294967168 }
  0x46   :  { %745 = dma.done.wait [#allocation6], 2048  }
  0x47   :  { %746 = vsyncadd [#allocation6], 4294965248 }
  0x48   :  { %747 = dma.done.wait [#allocation9], 1024  }
  0x49   :  { %748 = vsyncadd [#allocation9], 4294966272  ;;  %v757_v0 = vmov 0.0   ;;  %vm758_vm0 = vmmov 0   ;;  %v600_v1 = vld [vmem:[#allocation5] sm:$0xff]   ;;  %v601_v2 = vld [vmem:[#allocation5 + $0x8] sm:$0xff]  }
  0x4a   :  { %529 = vmatprep.subr.bf16.mxu0 %v757_v0  ;;  %545 = vmatprep.mubr.msk.bf16.mxu0 %vm758_vm0, %v757_v0  ;;  %v602_v3 = vld [vmem:[#allocation5 + $0x10] sm:$0xff]   ;;  %v609_v4 = vld [vmem:[#allocation7] sm:$0xff]   ;;  %v603_v5 = vld [vmem:[#allocation5 + $0x18] sm:$0xff]  }
  0x4b   :  { %549 = vmatprep.subr.bf16.mxu1 %v757_v0  ;;  %565 = vmatprep.mubr.msk.bf16.mxu1 %vm758_vm0, %v757_v0  ;;  %v610_v6 = vld [vmem:[#allocation7 + $0x8] sm:$0xff]   ;;  %v604_v7 = vld [vmem:[#allocation5 + $0x20] sm:$0xff]   ;;  %v611_v8 = vld [vmem:[#allocation7 + $0x10] sm:$0xff]  }
  0x4c   :  { %530 = vmatpush3.bf16.msra.mxu0 %v600_v1  ;;  %550 = vmatpush3.bf16.msra.mxu1 %v609_v4  ;;  %v605_v9 = vld [vmem:[#allocation5 + $0x28] sm:$0xff]   ;;  %v612_v10 = vld [vmem:[#allocation7 + $0x18] sm:$0xff]   ;;  %v606_v11 = vld [vmem:[#allocation5 + $0x30] sm:$0xff]  }
  0x4d   :  { %531 = vmatprep.subr.bf16.mxu0 %v757_v0  ;;  %551 = vmatprep.subr.bf16.mxu1 %v757_v0  ;;  %v613_v12 = vld [vmem:[#allocation7 + $0x20] sm:$0xff]   ;;  %v607_v13 = vld [vmem:[#allocation5 + $0x38] sm:$0xff]   ;;  %v614_v14 = vld [vmem:[#allocation7 + $0x28] sm:$0xff]  }
  0x4e   :  { %v608_v15 = vld [vmem:[#allocation2] sm:$0xff]   ;;  %v615_v16 = vld [vmem:[#allocation7 + $0x30] sm:$0xff]   ;;  %v617_v18 = vld [vmem:[#allocation8] sm:$0xff]  }
  0x4f   :  { %v616_v17 = vld [vmem:[#allocation7 + $0x38] sm:$0xff]   ;;  %v618_v19 = vld [vmem:[#allocation8 + $0x8] sm:$0xff]   ;;  %v619_v20 = vld [vmem:[#allocation8 + $0x10] sm:$0xff]  }
  0x50   :  { %532 = vmatpush3.bf16.msra.mxu0 %v601_v2  ;;  %552 = vmatpush3.bf16.msra.mxu1 %v610_v6  ;;  %v620_v21 = vld [vmem:[#allocation8 + $0x18] sm:$0xff]   ;;  %v621_v22 = vld [vmem:[#allocation8 + $0x20] sm:$0xff]   ;;  %v622_v23 = vld [vmem:[#allocation8 + $0x28] sm:$0xff]  }
  0x51   :  { %533 = vmatprep.subr.bf16.mxu0 %v757_v0  ;;  %553 = vmatprep.subr.bf16.mxu1 %v757_v0  ;;  %v474_v24 = vld [vmem:[%s929_s2] ss:$0 sm:$0xff]  ;;  %v623_v34 = vld [vmem:[#allocation8 + $0x30] sm:$0xff]  }
  0x52   :  { %v624_v35 = vld [vmem:[#allocation8 + $0x38] sm:$0xff]  }
  0x53   :  { %v484_v36 = vld [vmem:[%s931_s4] ss:$0 sm:$0xff]  ;;  %s759_s4 = smov [#allocation10]  }
  0x54   :  { %534 = vmatpush3.bf16.msra.mxu0 %v602_v3  ;;  %554 = vmatpush3.bf16.msra.mxu1 %v611_v8  ;;  %v493_v46 = vld [vmem:[%s933_s6] ss:$0 sm:$0xff]  ;;  %s460_s6 = sshll.u32 %s759_s4, 4  ;;  %s461_s6 = int_to_ptr.vmem [resolvable:$true] %s460_s6 }
  0x55   :  { %535 = vmatprep.subr.bf16.mxu0 %v757_v0  ;;  %555 = vmatprep.subr.bf16.mxu1 %v757_v0  ;;  %s721_s29 = scalar_lea.vmem %s461_s6, 256  ;;  %p726_p5 = scmp.lt.s32.totalorder %s461_s6, %s461_s6 }
  0x56   :  { %p722_p4 = scmp.ne.s32.totalorder %s461_s6, %s721_s29  ;;  %p727_p6 = scmp.lt.s32.totalorder %s721_s29, %s721_s29 }
  0x58   :  { %536 = vmatpush3.bf16.msra.mxu0 %v603_v5  ;;  %556 = vmatpush3.bf16.msra.mxu1 %v612_v10  ;;  %p728_p7 = por %p727_p6, %p726_p5 }
  0x59   :  { %537 = vmatprep.subr.bf16.mxu0 %v757_v0  ;;  %557 = vmatprep.subr.bf16.mxu1 %v757_v0 }
  0x5a   :  { %p729_p8 = pnand %p728_p7, %p722_p4 }
  0x5c   :  { %538 = vmatpush3.bf16.msra.mxu0 %v604_v7  ;;  %558 = vmatpush3.bf16.msra.mxu1 %v613_v12 }
  0x5d   :  { %539 = vmatprep.subr.bf16.mxu0 %v757_v0  ;;  %559 = vmatprep.subr.bf16.mxu1 %v757_v0 }
  0x60   :  { %540 = vmatpush3.bf16.msra.mxu0 %v605_v9  ;;  %560 = vmatpush3.bf16.msra.mxu1 %v614_v14 }
  0x61   :  { %541 = vmatprep.subr.bf16.mxu0 %v757_v0  ;;  %561 = vmatprep.subr.bf16.mxu1 %v757_v0 }
  0x64   :  { %542 = vmatpush3.bf16.msra.mxu0 %v606_v11  ;;  %562 = vmatpush3.bf16.msra.mxu1 %v615_v16 }
  0x65   :  { %543 = vmatprep.subr.bf16.mxu0 %v757_v0  ;;  %563 = vmatprep.subr.bf16.mxu1 %v757_v0 }
  0x68   :  { %544 = vmatpush3.bf16.msra.mxu0 %v607_v13  ;;  %564 = vmatpush3.bf16.msra.mxu1 %v616_v17 }
  0x69   :  { %569 = vmatprep.subr.bf16.mxu0 %v757_v0 }
  0x6b   :  { %546 = vmatmul.mubr.bf16.vlgmr.msra.gmra.mrb[0].mxu0 %v608_v15 }
  0x6c   :  { %585 = vmatprep.mubr.msk.bf16.mxu0 %vm758_vm0, %v757_v0  ;;  %570 = vmatpush3.bf16.msra.mxu0 %v617_v18 }
  0x6d   :  { %571 = vmatprep.subr.bf16.mxu0 %v757_v0 }
  0x70   :  { %572 = vmatpush3.bf16.msra.mxu0 %v618_v19 }
  0x71   :  { %573 = vmatprep.subr.bf16.mxu0 %v757_v0 }
  0x74   :  { %574 = vmatpush3.bf16.msra.mxu0 %v619_v20 }
  0x75   :  { %575 = vmatprep.subr.bf16.mxu0 %v757_v0 }
  0x78   :  { %576 = vmatpush3.bf16.msra.mxu0 %v620_v21 }
  0x79   :  { %577 = vmatprep.subr.bf16.mxu0 %v757_v0 }
  0x7c   :  { %578 = vmatpush3.bf16.msra.mxu0 %v621_v22 }
  0x7d   :  { %579 = vmatprep.subr.bf16.mxu0 %v757_v0 }
  0x80   :  { %580 = vmatpush3.bf16.msra.mxu0 %v622_v23 }
  0x81   :  { %581 = vmatprep.subr.bf16.mxu0 %v757_v0 }
  0x84   :  { %582 = vmatpush3.bf16.msra.mxu0 %v623_v34 }
  0x85   :  { %583 = vmatprep.subr.bf16.mxu0 %v757_v0 }
  0x88   :  { %584 = vmatpush3.bf16.msra.mxu0 %v624_v35 }
 0x13e   :  { %v196_v25 = vpop.f32.mrb[0].mxu0 }
 0x13f   :  { %v197_v26 = vadd.f32 %v474_v24, %v196_v25  ;;  %v547_v27 = vpop.f32.mrb[1].mxu0 }
 0x140   :  { %v199_v28 = vpop.f32.mrb[2].mxu0 }
 0x141   :  { %v200_v29 = vadd.f32 %v474_v24, %v199_v28  ;;  %v548_v30 = vpop.f32.mrb[3].mxu0  ;;  %v203_v31 = vmax.f32 %v197_v26, 0.0 }
 0x143   :  { %v204_v32 = vmax.f32 %v200_v29, 0.0 }
 0x145   :  { %v205_v33 = vpack.c.bf16 %v204_v32, %v203_v31 }
 0x147   :  { %566 = vmatmul.mubr.bf16.vlgmr.msra.gmra.mrb[0].mxu1 %v205_v33 }
 0x21a   :  { %v311_v37 = vpop.f32.mrb[0].mxu1 }
 0x21b   :  { %v312_v38 = vadd.f32 %v484_v36, %v311_v37  ;;  %v567_v39 = vpop.f32.mrb[1].mxu1 }
 0x21c   :  { %v314_v40 = vpop.f32.mrb[2].mxu1 }
 0x21d   :  { %v315_v41 = vadd.f32 %v484_v36, %v314_v40  ;;  %v568_v42 = vpop.f32.mrb[3].mxu1  ;;  %v318_v43 = vmax.f32 %v312_v38, 0.0 }
 0x21f   :  { %v319_v44 = vmax.f32 %v315_v41, 0.0 }
 0x221   :  { %v320_v45 = vpack.c.bf16 %v319_v44, %v318_v43 }
 0x223   :  { %586 = vmatmul.mubr.bf16.vlgmr.msra.gmra.mrb[4].mxu0 %v320_v45 }
 0x2f6   :  { %v426_v47 = vpop.f32.mrb[4].mxu0 }
 0x2f7   :  { %v427_v48 = vadd.f32 %v493_v46, %v426_v47  ;;  %v587_v49 = vpop.f32.mrb[5].mxu0 }
 0x2f8   :  { %v429_v50 = vpop.f32.mrb[6].mxu0 }
 0x2f9   :  { %433 = vmax.xlane.f32.xlu0 %v427_v48  ;;  %v588_v51 = vpop.f32.mrb[7].mxu0  ;;  %v430_v52 = vadd.f32 %v493_v46, %v429_v50 }
 0x2fd   :  { %435 = vmax.xlane.f32.xlu0 %v430_v52 }
 0x386   :  { %v434_v53 = vpop.xlane.xlu0 %433 }
 0x387   :  { %v437_v54 = vsub.f32 %v427_v48, %v434_v53 }
 0x389   :  { %v439_v55 = vmul.f32 1.442695, %v437_v54 }
 0x38a   :  { %v436_v56 = vpop.xlane.xlu0 %435 }
 0x38b   :  { %v438_v57 = vsub.f32 %v430_v52, %v436_v56  ;;  %625 = vpow2.f32 %v439_v55 }
 0x38d   :  { %v441_v58 = vmul.f32 1.442695, %v438_v57 }
 0x38f   :  { %627 = vpow2.f32 %v441_v58 }
 0x395   :  { %v626_v59 = vpop.eup %625 }
 0x396   :  { %443 = vadd.xlane.f32.xlu1 %v626_v59 }
 0x399   :  { %v628_v60 = vpop.eup %627 }
 0x39a   :  { %445 = vadd.xlane.f32.xlu1 %v628_v60 }
 0x423   :  { %v444_v61 = vpop.xlane.xlu1 %443 }
 0x424   :  { %629 = vlog2.f32 %v444_v61 }
 0x427   :  { %v446_v62 = vpop.xlane.xlu1 %445 }
 0x428   :  { %631 = vlog2.f32 %v446_v62 }
 0x42e   :  { %v630_v63 = vpop.eup %629 }
 0x42f   :  { %v448_v0 = vmul.f32 0.6931472, %v630_v63 }
 0x431   :  { %v451_v1 = vsub.f32 %v437_v54, %v448_v0 }
 0x432   :  { %v632_v2 = vpop.eup %631 }
 0x433   :  { %453 = vst [vmem:[#allocation10] sm:$0xff] %v451_v1  ;;  %v450_v3 = vmul.f32 0.6931472, %v632_v2 }
 0x435   :  { %v452_v4 = vsub.f32 %v438_v57, %v450_v3 }
 0x437   :  { %454 = vst [vmem:[#allocation10 + $0x8] sm:$0xff] %v452_v4 }
 0x438   :  { %732 = shalt.err (!%p729_p8)
}
 0x439   :  { %s733_s9 = scalar_lea.hbm %s934_s7, 256 }
 0x43a   :  { %p734_p9 = scmp.ne.s32.totalorder %s934_s7, %s733_s9  ;;  %p737_p10 = scmp.lt.u32.totalorder %s733_s9, %s934_s7 }
 0x43c   :  { %p739_p11 = pnand %p737_p10, %p734_p9 }
 0x43e   :  { %742 = shalt.err (!%p739_p11)
}
 0x43f   :  { %s760_s16 = smov 128   ;;  %s761_s0 = smov 8  }
 0x440   :  { %466 = dma.vmem_to_hbm [thread:$0]  %s461_s6, 256, %s934_s7, [#allocation4], %s760_s16, %s760_s16, %s761_s0  }
 0x441   :  { %749 = dma.done.wait [#allocation4], 256  }
 0x442   :  { %750 = vsyncadd [#allocation4], 4294967040 }
 0x443   :  { %470 = vsyncpa [#allocation3], 1 }
 0x444   :  { %471 = vsyncpa [#allocation6], 1 }
 0x445   :  { %472 = vsyncpa [#allocation9], 1 }
 0x446   :  { %473 = vsyncpa [#allocation4], 1 }

</bundles_post_ra>
